<compile_context>
chip_gen: v7x
topology: tpu7x:2x2x1
jax: 0.10.0
libtpu: 0.0.40
codegen_flags: <defaults>
</compile_context>

<pallas_src>
import jax
import jax.numpy as jnp
from jax.experimental import pallas as pl
from jax.experimental.pallas import tpu as pltpu

_LANE = 128      # vreg lane width
_SUBLANE = 8     # vreg sublane count


def xor_mlp_kernel(p_ref, x_ref, o_ref):
    """One (TR, 128) batch tile of the 2-4-1 MLP.

    p_ref: SMEM (17,) f32 packed params:
           [0:8] w1 (4,2) row-major, [8:12] b1 (4,), [12:16] w2 (1,4), [16] b2
    x_ref: VMEM (2, TR, 128) f32  -- feature-major, batch folded to (rows, lanes)
    o_ref: VMEM (TR, 128) f32
    """
    x0 = x_ref[0]                            # (TR, 128), dense full vregs
    x1 = x_ref[1]

    # Layer 1: Linear(2, 4) + ReLU, unrolled scalar*vector FMAs (pure VPU).
    h0 = jnp.maximum(p_ref[0] * x0 + p_ref[1] * x1 + p_ref[8], 0.0)
    h1 = jnp.maximum(p_ref[2] * x0 + p_ref[3] * x1 + p_ref[9], 0.0)
    h2 = jnp.maximum(p_ref[4] * x0 + p_ref[5] * x1 + p_ref[10], 0.0)
    h3 = jnp.maximum(p_ref[6] * x0 + p_ref[7] * x1 + p_ref[11], 0.0)

    # Layer 2: Linear(4, 1) + Sigmoid (exp goes to the EUP slot).
    y = (p_ref[12] * h0 + p_ref[13] * h1 + p_ref[14] * h2 + p_ref[15] * h3
         + p_ref[16])
    o_ref[...] = jax.nn.sigmoid(y)


def _round_up(n, m):
    return -(-n // m) * m


def _choose_row_tile(rows):
    """Row (sublane) tile for the (rows, 128) batch slab.

    TR=2048 -> 2 MiB input + 1 MiB output per step (~6 MiB double-buffered),
    which fits every generation's scoped-VMEM default.  Prefer a grid of
    >= 4 steps so the "parallel" axis can shard across v7x's 2 TensorCores.
    """
    candidates = (2048, 1024, 512, 256, 128, 64, 32, 16, 8)
    for tr in candidates:
        if rows % tr == 0 and rows // tr >= 4:
            return tr
    for tr in candidates:
        if rows % tr == 0:
            return tr
    return _SUBLANE


def xor_network_forward(x, w1, b1, w2, b2):
    """Forward pass of nn.Sequential(Linear(2,4), ReLU, Linear(4,1), Sigmoid).

    x : (B, 2) f32                               (PyTorch activation layout)
    w1: (4, 2), b1: (4,), w2: (1, 4), b2: (1,)   (PyTorch nn.Linear layout)
    returns (B, 1) f32.
    """
    B = x.shape[0]

    # All 17 parameters packed into one flat SMEM vector -> one tiny DMA.
    params = jnp.concatenate(
        [w1.reshape(-1), b1.reshape(-1), w2.reshape(-1), b2.reshape(-1)]
    ).astype(jnp.float32)                                    # (17,)

    # Fold the batch onto full (sublane, lane) tiles: element b -> (b//128, b%128).
    b_pad = _round_up(max(B, 1), _SUBLANE * _LANE)           # multiple of 1024
    rows = b_pad // _LANE
    tr = _choose_row_tile(rows)

    # Single pad (no zeros+scatter) -> feature-major slab (2, rows, 128).
    xt = jnp.pad(x.T.astype(jnp.float32), ((0, 0), (0, b_pad - B)))
    xt = xt.reshape(2, rows, _LANE)

    out = pl.pallas_call(
        xor_mlp_kernel,
        out_shape=jax.ShapeDtypeStruct((rows, _LANE), jnp.float32),
        grid=(rows // tr,),
        in_specs=[
            # Packed params in SMEM; constant block -> fetched once for the grid.
            pl.BlockSpec(memory_space=pltpu.MemorySpace.SMEM),
            # Sublane/lane-dense activation tile: (2, TR, 128), TR % 8 == 0.
            pl.BlockSpec((2, tr, _LANE), lambda i: (0, i, 0)),
        ],
        out_specs=pl.BlockSpec((tr, _LANE), lambda i: (i, 0)),
        compiler_params=pltpu.CompilerParams(
            dimension_semantics=("parallel",)),  # batch tiles shard on v7x 2-TC
    )(params, xt)

    return out.reshape(b_pad)[:B].reshape(B, 1)


def init_params(key):
    """Deterministic init mimicking nn.Linear's U(-1/sqrt(fan_in), +) in PyTorch layout."""
    k1, k2, k3, k4 = jax.random.split(key, 4)
    bound1 = 1.0 / jnp.sqrt(2.0)   # fan_in = 2
    bound2 = 1.0 / jnp.sqrt(4.0)   # fan_in = 4
    w1 = jax.random.uniform(k1, (4, 2), jnp.float32, -bound1, bound1)
    b1 = jax.random.uniform(k2, (4,), jnp.float32, -bound1, bound1)
    w2 = jax.random.uniform(k3, (1, 4), jnp.float32, -bound2, bound2)
    b2 = jax.random.uniform(k4, (1,), jnp.float32, -bound2, bound2)
    return w1, b1, w2, b2


def reference_forward(x, w1, b1, w2, b2):
    h = jnp.maximum(
        jnp.dot(x, w1.T, precision=jax.lax.Precision.HIGHEST) + b1, 0.0)
    return jax.nn.sigmoid(
        jnp.dot(h, w2.T, precision=jax.lax.Precision.HIGHEST) + b2)


if __name__ == "__main__":
    key = jax.random.PRNGKey(0)
    pkey, xkey = jax.random.split(key)
    w1, b1, w2, b2 = init_params(pkey)

    # Small batch of XOR-style 0/1 inputs (batch=8, features=2).
    x = jax.random.bernoulli(xkey, 0.5, (8, 2)).astype(jnp.float32)

    out = xor_network_forward(x, w1, b1, w2, b2)
    out = jax.block_until_ready(out)

    ref = reference_forward(x, w1, b1, w2, b2)
    assert out.shape == (8, 1)
    assert jnp.allclose(out, ref, atol=1e-6, rtol=1e-5)

    print("KERNEL_OK")
</pallas_src>

<mosaic_0001>
module attributes {stable_mosaic.version = 11 : i64} {
  func.func @xor_mlp_kernel(%arg0: i32, %arg1: memref<17xf32, #tpu.memory_space<smem>>, %arg2: memref<2x8x128xf32, #tpu.memory_space<vmem>>, %arg3: memref<8x128xf32, #tpu.memory_space<vmem>>) attributes {dimension_semantics = [#tpu.dimension_semantics<parallel>], iteration_bounds = array<i64: 1>, scalar_prefetch = 0 : i64, scratch_operands = 0 : i64, tpu.core_type = #tpu.core_type<tc>, window_params = [{transform_indices = @transform_0, window_bounds = array<i64: 17>}, {transform_indices = @transform_1, window_bounds = array<i64: 2, 8, 128>}, {transform_indices = @transform_2, window_bounds = array<i64: 8, 128>}]} {
    %c0 = arith.constant 0 : index
    %c0_0 = arith.constant 0 : index
    %c0_1 = arith.constant 0 : index
    %0 = vector.load %arg2[%c0, %c0_0, %c0_1] : memref<2x8x128xf32, #tpu.memory_space<vmem>>, vector<1x8x128xf32>
    %1 = vector.shape_cast %0 : vector<1x8x128xf32> to vector<8x128xf32>
    %c1 = arith.constant 1 : index
    %c0_2 = arith.constant 0 : index
    %c0_3 = arith.constant 0 : index
    %2 = vector.load %arg2[%c1, %c0_2, %c0_3] : memref<2x8x128xf32, #tpu.memory_space<vmem>>, vector<1x8x128xf32>
    %3 = vector.shape_cast %2 : vector<1x8x128xf32> to vector<8x128xf32>
    %c0_4 = arith.constant 0 : index
    %4 = memref.load %arg1[%c0_4] : memref<17xf32, #tpu.memory_space<smem>>
    %5 = vector.broadcast %4 : f32 to vector<8x128xf32>
    %6 = arith.mulf %5, %1 : vector<8x128xf32>
    %c1_5 = arith.constant 1 : index
    %7 = memref.load %arg1[%c1_5] : memref<17xf32, #tpu.memory_space<smem>>
    %8 = vector.broadcast %7 : f32 to vector<8x128xf32>
    %9 = arith.mulf %8, %3 : vector<8x128xf32>
    %10 = arith.addf %6, %9 : vector<8x128xf32>
    %c8 = arith.constant 8 : index
    %11 = memref.load %arg1[%c8] : memref<17xf32, #tpu.memory_space<smem>>
    %12 = vector.broadcast %11 : f32 to vector<8x128xf32>
    %13 = arith.addf %10, %12 : vector<8x128xf32>
    %cst = arith.constant 0.000000e+00 : f32
    %14 = vector.broadcast %cst : f32 to vector<8x128xf32>
    %15 = arith.maximumf %13, %14 : vector<8x128xf32>
    %c2 = arith.constant 2 : index
    %16 = memref.load %arg1[%c2] : memref<17xf32, #tpu.memory_space<smem>>
    %17 = vector.broadcast %16 : f32 to vector<8x128xf32>
    %18 = arith.mulf %17, %1 : vector<8x128xf32>
    %c3 = arith.constant 3 : index
    %19 = memref.load %arg1[%c3] : memref<17xf32, #tpu.memory_space<smem>>
    %20 = vector.broadcast %19 : f32 to vector<8x128xf32>
    %21 = arith.mulf %20, %3 : vector<8x128xf32>
    %22 = arith.addf %18, %21 : vector<8x128xf32>
    %c9 = arith.constant 9 : index
    %23 = memref.load %arg1[%c9] : memref<17xf32, #tpu.memory_space<smem>>
    %24 = vector.broadcast %23 : f32 to vector<8x128xf32>
    %25 = arith.addf %22, %24 : vector<8x128xf32>
    %cst_6 = arith.constant 0.000000e+00 : f32
    %26 = vector.broadcast %cst_6 : f32 to vector<8x128xf32>
    %27 = arith.maximumf %25, %26 : vector<8x128xf32>
    %c4 = arith.constant 4 : index
    %28 = memref.load %arg1[%c4] : memref<17xf32, #tpu.memory_space<smem>>
    %29 = vector.broadcast %28 : f32 to vector<8x128xf32>
    %30 = arith.mulf %29, %1 : vector<8x128xf32>
    %c5 = arith.constant 5 : index
    %31 = memref.load %arg1[%c5] : memref<17xf32, #tpu.memory_space<smem>>
    %32 = vector.broadcast %31 : f32 to vector<8x128xf32>
    %33 = arith.mulf %32, %3 : vector<8x128xf32>
    %34 = arith.addf %30, %33 : vector<8x128xf32>
    %c10 = arith.constant 10 : index
    %35 = memref.load %arg1[%c10] : memref<17xf32, #tpu.memory_space<smem>>
    %36 = vector.broadcast %35 : f32 to vector<8x128xf32>
    %37 = arith.addf %34, %36 : vector<8x128xf32>
    %cst_7 = arith.constant 0.000000e+00 : f32
    %38 = vector.broadcast %cst_7 : f32 to vector<8x128xf32>
    %39 = arith.maximumf %37, %38 : vector<8x128xf32>
    %c6 = arith.constant 6 : index
    %40 = memref.load %arg1[%c6] : memref<17xf32, #tpu.memory_space<smem>>
    %41 = vector.broadcast %40 : f32 to vector<8x128xf32>
    %42 = arith.mulf %41, %1 : vector<8x128xf32>
    %c7 = arith.constant 7 : index
    %43 = memref.load %arg1[%c7] : memref<17xf32, #tpu.memory_space<smem>>
    %44 = vector.broadcast %43 : f32 to vector<8x128xf32>
    %45 = arith.mulf %44, %3 : vector<8x128xf32>
    %46 = arith.addf %42, %45 : vector<8x128xf32>
    %c11 = arith.constant 11 : index
    %47 = memref.load %arg1[%c11] : memref<17xf32, #tpu.memory_space<smem>>
    %48 = vector.broadcast %47 : f32 to vector<8x128xf32>
    %49 = arith.addf %46, %48 : vector<8x128xf32>
    %cst_8 = arith.constant 0.000000e+00 : f32
    %50 = vector.broadcast %cst_8 : f32 to vector<8x128xf32>
    %51 = arith.maximumf %49, %50 : vector<8x128xf32>
    %c12 = arith.constant 12 : index
    %52 = memref.load %arg1[%c12] : memref<17xf32, #tpu.memory_space<smem>>
    %53 = vector.broadcast %52 : f32 to vector<8x128xf32>
    %54 = arith.mulf %53, %15 : vector<8x128xf32>
    %c13 = arith.constant 13 : index
    %55 = memref.load %arg1[%c13] : memref<17xf32, #tpu.memory_space<smem>>
    %56 = vector.broadcast %55 : f32 to vector<8x128xf32>
    %57 = arith.mulf %56, %27 : vector<8x128xf32>
    %58 = arith.addf %54, %57 : vector<8x128xf32>
    %c14 = arith.constant 14 : index
    %59 = memref.load %arg1[%c14] : memref<17xf32, #tpu.memory_space<smem>>
    %60 = vector.broadcast %59 : f32 to vector<8x128xf32>
    %61 = arith.mulf %60, %39 : vector<8x128xf32>
    %62 = arith.addf %58, %61 : vector<8x128xf32>
    %c15 = arith.constant 15 : index
    %63 = memref.load %arg1[%c15] : memref<17xf32, #tpu.memory_space<smem>>
    %64 = vector.broadcast %63 : f32 to vector<8x128xf32>
    %65 = arith.mulf %64, %51 : vector<8x128xf32>
    %66 = arith.addf %62, %65 : vector<8x128xf32>
    %c16 = arith.constant 16 : index
    %67 = memref.load %arg1[%c16] : memref<17xf32, #tpu.memory_space<smem>>
    %68 = vector.broadcast %67 : f32 to vector<8x128xf32>
    %69 = arith.addf %66, %68 : vector<8x128xf32>
    %70 = arith.negf %69 : vector<8x128xf32>
    %71 = math.exp %70 : vector<8x128xf32>
    %cst_9 = arith.constant 1.000000e+00 : f32
    %72 = vector.broadcast %cst_9 : f32 to vector<8x128xf32>
    %73 = arith.addf %72, %71 : vector<8x128xf32>
    %74 = arith.divf %72, %73 : vector<8x128xf32>
    %c0_10 = arith.constant 0 : index
    %c0_11 = arith.constant 0 : index
    %75 = vector.load %arg3[%c0_10, %c0_11] : memref<8x128xf32, #tpu.memory_space<vmem>>, vector<8x128xf32>
    tpu.vector_store %arg3[%c0_10, %c0_11], %74 {strides = array<i32>} : memref<8x128xf32, #tpu.memory_space<vmem>>, vector<8x128xf32>,
    return
  }
  func.func @transform_0(%arg0: i32) -> i32 {
    %c0_i32 = arith.constant 0 : i32
    %c0_i32_0 = arith.constant 0 : i32
    return %c0_i32 : i32
  }
  func.func @transform_1(%arg0: i32) -> (i32, i32, i32) {
    %c0_i32 = arith.constant 0 : i32
    %c0_i32_0 = arith.constant 0 : i32
    %c0_i32_1 = arith.constant 0 : i32
    return %c0_i32, %arg0, %c0_i32_0 : i32, i32, i32
  }
  func.func @transform_2(%arg0: i32) -> (i32, i32) {
    %c0_i32 = arith.constant 0 : i32
    %c0_i32_0 = arith.constant 0 : i32
    return %arg0, %c0_i32 : i32, i32
  }
}

</mosaic_0001>

<bundles_post_ra>
// kernel: tpu_custom_call.1
= control target key start
LH: loop header
LB: loop body
LE: loop exit
PB: predicated region body
PF: predicated region fallthrough
CT: control target
= control target key end

     0   :  { %7 = vsyncpa [#allocation5], 0  ;;  %s288_s0 = inlined_call_operand.hbm [shape: f32[17], index: 0, kind: input, shape index: {}]   ;;  %s289_s1 = inlined_call_operand.hbm [shape: f32[2,8,128], index: 1, kind: input, shape index: {}]   ;;  %s290_s2 = inlined_call_operand.hbm [shape: f32[8,128], index: 2, kind: output, shape index: {}]  }
   0x1   :  { %8 = vsyncpa [#allocation3], 0 }
   0x2   :  { %9 = vsyncpa [#allocation4], 0  ;;  %s151_s11 = scalar_lea.hbm %s288_s0, 16 }
   0x3   :  { %p152_p0 = scmp.ne.s32.totalorder %s288_s0, %s151_s11  ;;  %p155_p1 = scmp.lt.u32.totalorder %s151_s11, %s288_s0 }
   0x5   :  { %p157_p2 = pnand %p155_p1, %p152_p0 }
   0x7   :  { %160 = shalt.err (!%p157_p2)
}
   0x8   :  { %s211_s16 = smov [#allocation2]   ;;  %s212_s19 = smov [#allocation6]  }
   0x9   :  { %17 = dma.hbm_to_smem %s288_s0, 16, %s211_s16, [#allocation5]  }
   0xa   :  { %s23_s20 = sshll.u32 %s212_s19, 4  ;;  %s161_s23 = scalar_lea.hbm %s289_s1, 256  ;;  %s24_s20 = int_to_ptr.vmem [resolvable:$true] %s23_s20 }
   0xb   :  { %p162_p3 = scmp.ne.s32.totalorder %s289_s1, %s161_s23  ;;  %p165_p4 = scmp.lt.u32.totalorder %s161_s23, %s289_s1 }
   0xd   :  { %p167_p5 = pnand %p165_p4, %p162_p3 }
   0xf   :  { %170 = shalt.err (!%p167_p5)
}
  0x10   :  { %s171_s28 = scalar_lea.vmem %s24_s20, 256  ;;  %p176_p7 = scmp.lt.s32.totalorder %s24_s20, %s24_s20 }
  0x11   :  { %p172_p6 = scmp.ne.s32.totalorder %s24_s20, %s171_s28  ;;  %p177_p8 = scmp.lt.s32.totalorder %s171_s28, %s171_s28 }
  0x13   :  { %p178_p9 = por %p177_p8, %p176_p7 }
  0x15   :  { %p179_p10 = pnand %p178_p9, %p172_p6 }
  0x17   :  { %182 = shalt.err (!%p179_p10)
}
  0x18   :  { %s213_s0 = smov 128   ;;  %s214_s29 = smov 8  }
  0x19   :  { %29 = dma.hbm_to_vmem [thread:$0]  %s289_s1, 256, %s24_s20, [#allocation3], %s213_s0, %s213_s0, %s214_s29  }
  0x1a   :  { %205 = dma.done.wait [#allocation5], 16  }
  0x1b   :  { %206 = vsyncadd [#allocation5], 4294967280 }
  0x1c   :  { %207 = dma.done.wait [#allocation3], 256  }
  0x1d   :  { %208 = vsyncadd [#allocation3], 4294967040 }
  0x1e   :  { %36 = sfence }
  0x1f   :  { %s40_s4 = sld [smem:[#allocation2]]  ;;  %s125_s5 = sld [smem:[#allocation2 + $0x1]]  ;;  %v37_v0 = vld [vmem:[#allocation6] sm:$0xff]  ;;  %v39_v1 = vld [vmem:[#allocation6 + $0x8] sm:$0xff] }
  0x20   :  { %s255_s6 = sld [smem:[#allocation2 + $0x8]]  ;;  %s127_s7 = sld [smem:[#allocation2 + $0x2]] }
  0x21   :  { %s128_s8 = sld [smem:[#allocation2 + $0x3]]  ;;  %s257_s9 = sld [smem:[#allocation2 + $0x9]] }
  0x22   :  { %s130_s10 = sld [smem:[#allocation2 + $0x4]]  ;;  %s131_s11 = sld [smem:[#allocation2 + $0x5]] }
  0x23   :  { %s259_s1 = sld [smem:[#allocation2 + $0xa]]  ;;  %s133_s12 = sld [smem:[#allocation2 + $0x6]] }
  0x24   :  { %s134_s13 = sld [smem:[#allocation2 + $0x7]]  ;;  %s261_s14 = sld [smem:[#allocation2 + $0xb]] }
  0x25   :  { %v41_v2 = vstv %s40_s4  ;;  %v44_v3 = vstv %s125_s5  ;;  %s263_s15 = sld [smem:[#allocation2 + $0xc]]  ;;  %s265_s16 = sld [smem:[#allocation2 + $0xd]] }
  0x26   :  { %v42_v4 = vmul.f32 %v41_v2, %v37_v0  ;;  %v45_v5 = vmul.f32 %v44_v3, %v39_v1  ;;  %v52_v6 = vstv %s127_s7  ;;  %s267_s17 = sld [smem:[#allocation2 + $0xe]]  ;;  %v48_v7 = vstv %s255_s6  ;;  %s139_s18 = sld [smem:[#allocation2 + $0xf]] }
  0x27   :  { %v53_v8 = vmul.f32 %v52_v6, %v37_v0  ;;  %v55_v9 = vstv %s128_s8  ;;  %v59_v10 = vstv %s257_s9  ;;  %s140_s19 = sld [smem:[#allocation2 + $0x10]]  ;;  %s215_s20 = smov [#allocation7]  }
  0x28   :  { %v46_v11 = vadd.f32 %v45_v5, %v42_v4  ;;  %v56_v12 = vmul.f32 %v55_v9, %v39_v1  ;;  %v63_v13 = vstv %s130_s10  ;;  %v66_v14 = vstv %s131_s11  ;;  %s115_s21 = sshll.u32 %s215_s20, 4  ;;  %s116_s21 = int_to_ptr.vmem [resolvable:$true] %s115_s21 }
  0x29   :  { %v64_v15 = vmul.f32 %v63_v13, %v37_v0  ;;  %v67_v16 = vmul.f32 %v66_v14, %v39_v1  ;;  %v70_v17 = vstv %s259_s1  ;;  %v74_v18 = vstv %s133_s12  ;;  %s183_s22 = scalar_lea.vmem %s116_s21, 128  ;;  %p188_p12 = scmp.lt.s32.totalorder %s116_s21, %s116_s21 }
  0x2a   :  { %v49_v19 = vadd.f32 %v48_v7, %v46_v11  ;;  %v57_v20 = vadd.f32 %v56_v12, %v53_v8  ;;  %v75_v21 = vmul.f32 %v74_v18, %v37_v0  ;;  %v77_v22 = vstv %s134_s13  ;;  %p184_p11 = scmp.ne.s32.totalorder %s116_s21, %s183_s22  ;;  %p189_p13 = scmp.lt.s32.totalorder %s183_s22, %s183_s22 }
  0x2b   :  { %v68_v23 = vadd.f32 %v67_v16, %v64_v15  ;;  %v78_v24 = vmul.f32 %v77_v22, %v39_v1  ;;  %v85_v25 = vstv %s263_s15  ;;  %v81_v28 = vstv %s261_s14 }
  0x2c   :  { %v50_v26 = vmax.f32 %v49_v19, 0.0  ;;  %v60_v27 = vadd.f32 %v59_v10, %v57_v20  ;;  %v88_v31 = vstv %s265_s16  ;;  %v92_v34 = vstv %s267_s17  ;;  %p190_p0 = por %p189_p13, %p188_p12 }
  0x2d   :  { %v71_v29 = vadd.f32 %v70_v17, %v68_v23  ;;  %v79_v30 = vadd.f32 %v78_v24, %v75_v21  ;;  %v96_v38 = vstv %s139_s18  ;;  %v100_v44 = vstv %s140_s19 }
  0x2e   :  { %v61_v32 = vmax.f32 %v60_v27, 0.0  ;;  %v86_v33 = vmul.f32 %v85_v25, %v50_v26  ;;  %p191_p1 = pnand %p190_p0, %p184_p11 }
  0x2f   :  { %v72_v35 = vmax.f32 %v71_v29, 0.0  ;;  %v82_v36 = vadd.f32 %v81_v28, %v79_v30 }
  0x30   :  { %v89_v37 = vmul.f32 %v88_v31, %v61_v32 }
  0x31   :  { %v83_v39 = vmax.f32 %v82_v36, 0.0  ;;  %v93_v40 = vmul.f32 %v92_v34, %v72_v35 }
  0x32   :  { %v90_v41 = vadd.f32 %v89_v37, %v86_v33 }
  0x33   :  { %v97_v42 = vmul.f32 %v96_v38, %v83_v39 }
  0x34   :  { %v94_v43 = vadd.f32 %v93_v40, %v90_v41 }
  0x36   :  { %v98_v45 = vadd.f32 %v97_v42, %v94_v43 }
  0x38   :  { %v101_v46 = vadd.f32 %v100_v44, %v98_v45 }
  0x3a   :  { %v141_v47 = vmul.f32 -1.442695, %v101_v46 }
  0x3c   :  { %147 = vpow2.f32 %v141_v47 }
  0x46   :  { %v148_v48 = vpop.eup %147 }
  0x47   :  { %v105_v49 = vadd.f32 1.0, %v148_v48 }
  0x49   :  { %149 = vrcp.f32 %v105_v49 }
  0x53   :  { %v150_v50 = vpop.eup %149 }
  0x54   :  { %108 = vst [vmem:[#allocation7] sm:$0xff] %v150_v50 }
  0x55   :  { %194 = shalt.err (!%p191_p1)
}
  0x56   :  { %s195_s25 = scalar_lea.hbm %s290_s2, 128 }
  0x57   :  { %p196_p2 = scmp.ne.s32.totalorder %s290_s2, %s195_s25  ;;  %p199_p3 = scmp.lt.u32.totalorder %s195_s25, %s290_s2 }
  0x59   :  { %p201_p4 = pnand %p199_p3, %p196_p2 }
  0x5b   :  { %204 = shalt.err (!%p201_p4)
}
  0x5c   :  { %118 = dma.vmem_to_hbm [thread:$0]  %s116_s21, 128, %s290_s2, [#allocation4]  }
  0x5d   :  { %209 = dma.done.wait [#allocation4], 128  }
  0x5e   :  { %210 = vsyncadd [#allocation4], 4294967168 }
  0x5f   :  { %122 = vsyncpa [#allocation3], 1 }
  0x60   :  { %123 = vsyncpa [#allocation4], 1 }
  0x61   :  { %124 = vsyncpa [#allocation5], 1 }

</bundles_post_ra>
